<compile_context>
chip_gen: v7x
topology: tpu7x:2x2x1
jax: 0.10.0
libtpu: 0.0.40
codegen_flags: <defaults>
</compile_context>

<pallas_src>
import jax
import jax.numpy as jnp
from jax.experimental import pallas as pl
from jax.experimental.pallas import tpu as pltpu

# TODO(synk): 'PSD' (CalculateNormPSD) and 'NegMCC' (NegativeMaxCrossCorr) variants are not
# defined in the provided module source; only the 'MSE' distance path is implemented here.


def mvtl_kernel(anc_ref, pos_ref, neg_ref, out_ref):
    """One lane-tile of the signal; all T x T view comparisons via the O(T) identity.

    anc_ref/pos_ref/neg_ref : (T, B, tn) VMEM tiles
    out_ref                 : (B, tn)    VMEM tile
    """
    T = anc_ref.shape[0]

    # One pass over the T views; each view is loaded from VMEM exactly once.
    a_sum = anc_ref[0].astype(jnp.float32)                 # sum_i a_i
    p = pos_ref[0].astype(jnp.float32)
    n = neg_ref[0].astype(jnp.float32)
    sq_diff = p * p - n * n                                # sum_j (p_j^2 - n_j^2)
    lin_diff = p - n                                       # sum_j (p_j - n_j)
    for j in range(1, T):                                  # T is small & static -> unrolled
        a_sum = a_sum + anc_ref[j].astype(jnp.float32)
        p = pos_ref[j].astype(jnp.float32)
        n = neg_ref[j].astype(jnp.float32)
        sq_diff = sq_diff + (p * p - n * n)
        lin_diff = lin_diff + (p - n)

    # pos_loss - neg_loss == T*sum_j(p_j^2 - n_j^2) - 2*(sum_i a_i)*(sum_j(p_j - n_j))
    diff = jnp.float32(T) * sq_diff - 2.0 * a_sum * lin_diff
    # Reproduce the module's trailing "/ T * T" (cancels mathematically; kept for parity).
    out_ref[...] = ((diff / T) * T).astype(out_ref.dtype)


def _choose_tile(N, T, B, itemsize, budget_bytes=8 * 1024 * 1024, max_tn=4096):
    """Widest lane tile (multiple of 128 dividing N, or N itself) whose double-buffered
    VMEM footprint (3 inputs + 1 output, x2 buffers) stays under `budget_bytes`."""
    per_lane = 2 * (3 * T + 1) * B * itemsize
    cap = min(max_tn, max(128, budget_bytes // max(per_lane, 1)))
    if N <= cap:
        return N                                           # single full-width block
    tn = (cap // 128) * 128
    while tn >= 128:
        if N % tn == 0:
            return tn
        tn -= 128
    return N                                               # no 128-multiple divisor: un-tiled


def multi_view_triplet_loss(anc, pos, neg, *, tn=None):
    """anc/pos/neg: [T, B, N] stacked temporal views. Returns [B, N]."""
    T, B, N = anc.shape
    assert pos.shape == (T, B, N) and neg.shape == (T, B, N)
    itemsize = jnp.dtype(anc.dtype).itemsize
    if tn is None:
        tn = _choose_tile(N, T, B, itemsize)
    assert N % tn == 0

    in_spec = pl.BlockSpec((T, B, tn), lambda n: (0, 0, n))
    out_spec = pl.BlockSpec((B, tn), lambda n: (0, n))

    # Advisory cost hint: pure elementwise / mem-bound workload (no MXU).
    bytes_accessed = (3 * T + 1) * B * N * itemsize
    flops = (7 * T + 6) * B * N

    return pl.pallas_call(
        mvtl_kernel,
        out_shape=jax.ShapeDtypeStruct((B, N), anc.dtype),
        grid=(N // tn,),
        in_specs=[in_spec, in_spec, in_spec],
        out_specs=out_spec,
        compiler_params=pltpu.CompilerParams(
            dimension_semantics=("parallel",),
            # Portable across v5e (16 MiB scoped default) / v6e / v7x (64 MiB physical).
            vmem_limit_bytes=32 * 1024 * 1024,
        ),
        cost_estimate=pl.CostEstimate(
            flops=flops, transcendentals=0, bytes_accessed=bytes_accessed
        ),
    )(anc, pos, neg)


def multi_view_triplet_loss_ref(anc, pos, neg):
    """Pure-JAX reference mirroring the PyTorch forward (explicit T x T loop)."""
    T = anc.shape[0]
    pos_loss = 0.0
    neg_loss = 0.0
    for i in range(T):
        for j in range(T):
            pos_loss = pos_loss + (anc[i] - pos[j]) ** 2
            neg_loss = neg_loss + (anc[i] - neg[j]) ** 2
    return (pos_loss - neg_loss) / T * T


if __name__ == "__main__":
    key = jax.random.PRNGKey(0)

    # Test 1: small demo shape (2 temporal views, batch 8, 256 samples per rPPG signal).
    # Collapses to a single wide block (grid of 1 step).
    T, B, N = 2, 8, 256
    k_anc, k_pos, k_neg = jax.random.split(key, 3)
    anc = jax.random.normal(k_anc, (T, B, N), dtype=jnp.float32)
    pos = jax.random.normal(k_pos, (T, B, N), dtype=jnp.float32)
    neg = jax.random.normal(k_neg, (T, B, N), dtype=jnp.float32)

    out = jax.block_until_ready(multi_view_triplet_loss(anc, pos, neg))
    ref = multi_view_triplet_loss_ref(anc, pos, neg)
    assert out.shape == (B, N)
    assert jnp.allclose(out, ref, atol=1e-4, rtol=1e-4)

    # Test 2: longer signal exercising the tiled path (tn=4096 -> 2 parallel grid steps,
    # which also feeds both TensorCores on v7x).
    T2, B2, N2 = 2, 8, 8192
    k2 = jax.random.PRNGKey(1)
    k_anc2, k_pos2, k_neg2 = jax.random.split(k2, 3)
    anc2 = jax.random.normal(k_anc2, (T2, B2, N2), dtype=jnp.float32)
    pos2 = jax.random.normal(k_pos2, (T2, B2, N2), dtype=jnp.float32)
    neg2 = jax.random.normal(k_neg2, (T2, B2, N2), dtype=jnp.float32)

    out2 = jax.block_until_ready(multi_view_triplet_loss(anc2, pos2, neg2))
    ref2 = multi_view_triplet_loss_ref(anc2, pos2, neg2)
    assert out2.shape == (B2, N2)
    assert jnp.allclose(out2, ref2, atol=1e-4, rtol=1e-4)

    print("KERNEL_OK")
</pallas_src>

<mosaic_0001>
module attributes {stable_mosaic.version = 11 : i64} {
  func.func @mvtl_kernel(%arg0: i32, %arg1: memref<2x8x256xf32, #tpu.memory_space<vmem>>, %arg2: memref<2x8x256xf32, #tpu.memory_space<vmem>>, %arg3: memref<2x8x256xf32, #tpu.memory_space<vmem>>, %arg4: memref<8x256xf32, #tpu.memory_space<vmem>>) attributes {dimension_semantics = [#tpu.dimension_semantics<parallel>], iteration_bounds = array<i64: 1>, scalar_prefetch = 0 : i64, scratch_operands = 0 : i64, tpu.core_type = #tpu.core_type<tc>, window_params = [{transform_indices = @transform_0, window_bounds = array<i64: 2, 8, 256>}, {transform_indices = @transform_1, window_bounds = array<i64: 2, 8, 256>}, {transform_indices = @transform_2, window_bounds = array<i64: 2, 8, 256>}, {transform_indices = @transform_3, window_bounds = array<i64: 8, 256>}]} {
    %c0 = arith.constant 0 : index
    %c0_0 = arith.constant 0 : index
    %c0_1 = arith.constant 0 : index
    %0 = vector.load %arg1[%c0, %c0_0, %c0_1] : memref<2x8x256xf32, #tpu.memory_space<vmem>>, vector<1x8x256xf32>
    %1 = vector.shape_cast %0 : vector<1x8x256xf32> to vector<8x256xf32>
    %c0_2 = arith.constant 0 : index
    %c0_3 = arith.constant 0 : index
    %c0_4 = arith.constant 0 : index
    %2 = vector.load %arg2[%c0_2, %c0_3, %c0_4] : memref<2x8x256xf32, #tpu.memory_space<vmem>>, vector<1x8x256xf32>
    %3 = vector.shape_cast %2 : vector<1x8x256xf32> to vector<8x256xf32>
    %c0_5 = arith.constant 0 : index
    %c0_6 = arith.constant 0 : index
    %c0_7 = arith.constant 0 : index
    %4 = vector.load %arg3[%c0_5, %c0_6, %c0_7] : memref<2x8x256xf32, #tpu.memory_space<vmem>>, vector<1x8x256xf32>
    %5 = vector.shape_cast %4 : vector<1x8x256xf32> to vector<8x256xf32>
    %6 = arith.mulf %3, %3 : vector<8x256xf32>
    %7 = arith.mulf %5, %5 : vector<8x256xf32>
    %8 = arith.subf %6, %7 : vector<8x256xf32>
    %9 = arith.subf %3, %5 : vector<8x256xf32>
    %c1 = arith.constant 1 : index
    %c0_8 = arith.constant 0 : index
    %c0_9 = arith.constant 0 : index
    %10 = vector.load %arg1[%c1, %c0_8, %c0_9] : memref<2x8x256xf32, #tpu.memory_space<vmem>>, vector<1x8x256xf32>
    %11 = vector.shape_cast %10 : vector<1x8x256xf32> to vector<8x256xf32>
    %12 = arith.addf %1, %11 : vector<8x256xf32>
    %c1_10 = arith.constant 1 : index
    %c0_11 = arith.constant 0 : index
    %c0_12 = arith.constant 0 : index
    %13 = vector.load %arg2[%c1_10, %c0_11, %c0_12] : memref<2x8x256xf32, #tpu.memory_space<vmem>>, vector<1x8x256xf32>
    %14 = vector.shape_cast %13 : vector<1x8x256xf32> to vector<8x256xf32>
    %c1_13 = arith.constant 1 : index
    %c0_14 = arith.constant 0 : index
    %c0_15 = arith.constant 0 : index
    %15 = vector.load %arg3[%c1_13, %c0_14, %c0_15] : memref<2x8x256xf32, #tpu.memory_space<vmem>>, vector<1x8x256xf32>
    %16 = vector.shape_cast %15 : vector<1x8x256xf32> to vector<8x256xf32>
    %17 = arith.mulf %14, %14 : vector<8x256xf32>
    %18 = arith.mulf %16, %16 : vector<8x256xf32>
    %19 = arith.subf %17, %18 : vector<8x256xf32>
    %20 = arith.addf %8, %19 : vector<8x256xf32>
    %21 = arith.subf %14, %16 : vector<8x256xf32>
    %22 = arith.addf %9, %21 : vector<8x256xf32>
    %cst = arith.constant 2.000000e+00 : f32
    %23 = vector.broadcast %cst : f32 to vector<8x256xf32>
    %24 = arith.mulf %23, %20 : vector<8x256xf32>
    %cst_16 = arith.constant 2.000000e+00 : f32
    %25 = vector.broadcast %cst_16 : f32 to vector<8x256xf32>
    %26 = arith.mulf %25, %12 : vector<8x256xf32>
    %27 = arith.mulf %26, %22 : vector<8x256xf32>
    %28 = arith.subf %24, %27 : vector<8x256xf32>
    %cst_17 = arith.constant 2.000000e+00 : f32
    %29 = vector.broadcast %cst_17 : f32 to vector<8x256xf32>
    %30 = arith.divf %28, %29 : vector<8x256xf32>
    %cst_18 = arith.constant 2.000000e+00 : f32
    %31 = vector.broadcast %cst_18 : f32 to vector<8x256xf32>
    %32 = arith.mulf %30, %31 : vector<8x256xf32>
    %c0_19 = arith.constant 0 : index
    %c0_20 = arith.constant 0 : index
    %33 = vector.load %arg4[%c0_19, %c0_20] : memref<8x256xf32, #tpu.memory_space<vmem>>, vector<8x256xf32>
    tpu.vector_store %arg4[%c0_19, %c0_20], %32 {strides = array<i32>} : memref<8x256xf32, #tpu.memory_space<vmem>>, vector<8x256xf32>,
    return
  }
  func.func @transform_0(%arg0: i32) -> (i32, i32, i32) {
    %c0_i32 = arith.constant 0 : i32
    %c0_i32_0 = arith.constant 0 : i32
    %c0_i32_1 = arith.constant 0 : i32
    return %c0_i32, %c0_i32_0, %arg0 : i32, i32, i32
  }
  func.func @transform_1(%arg0: i32) -> (i32, i32, i32) {
    %c0_i32 = arith.constant 0 : i32
    %c0_i32_0 = arith.constant 0 : i32
    %c0_i32_1 = arith.constant 0 : i32
    return %c0_i32, %c0_i32_0, %arg0 : i32, i32, i32
  }
  func.func @transform_2(%arg0: i32) -> (i32, i32, i32) {
    %c0_i32 = arith.constant 0 : i32
    %c0_i32_0 = arith.constant 0 : i32
    %c0_i32_1 = arith.constant 0 : i32
    return %c0_i32, %c0_i32_0, %arg0 : i32, i32, i32
  }
  func.func @transform_3(%arg0: i32) -> (i32, i32) {
    %c0_i32 = arith.constant 0 : i32
    %c0_i32_0 = arith.constant 0 : i32
    return %c0_i32, %arg0 : i32, i32
  }
}

</mosaic_0001>

<bundles_post_ra>
// kernel: tpu_custom_call.1
= control target key start
LH: loop header
LB: loop body
LE: loop exit
PB: predicated region body
PF: predicated region fallthrough
CT: control target
= control target key end

     0   :  { %8 = vsyncpa [#allocation3], 0  ;;  %s314_s0 = inlined_call_operand.hbm [shape: f32[2,8,256], index: 0, kind: input, shape index: {}]   ;;  %s315_s1 = inlined_call_operand.hbm [shape: f32[2,8,256], index: 1, kind: input, shape index: {}]   ;;  %s316_s2 = inlined_call_operand.hbm [shape: f32[2,8,256], index: 2, kind: input, shape index: {}]   ;;  %s317_s3 = inlined_call_operand.hbm [shape: f32[8,256], index: 3, kind: output, shape index: {}]  }
   0x1   :  { %9 = vsyncpa [#allocation6], 0 }
   0x2   :  { %10 = vsyncpa [#allocation4], 0  ;;  %s224_s12 = smov [#allocation5]   ;;  %s225_s14 = smov [#allocation2]  }
   0x3   :  { %s28_s13 = sshll.u32 %s224_s12, 4  ;;  %s16_s15 = sshll.u32 %s225_s14, 4  ;;  %s29_s13 = int_to_ptr.vmem [resolvable:$true] %s28_s13  ;;  %s250_s15 = int_to_ptr.vmem [resolvable:$true] %s16_s15 }
   0x4   :  { %s130_s18 = scalar_lea.hbm %s315_s1, 512 }
   0x5   :  { %p131_p0 = scmp.ne.s32.totalorder %s315_s1, %s130_s18  ;;  %p134_p1 = scmp.lt.u32.totalorder %s130_s18, %s315_s1 }
   0x7   :  { %p136_p2 = pnand %p134_p1, %p131_p0 }
   0x9   :  { %139 = shalt.err (!%p136_p2)
}
   0xa   :  { %s140_s23 = scalar_lea.vmem %s29_s13, 512  ;;  %p145_p4 = scmp.lt.s32.totalorder %s29_s13, %s29_s13 }
   0xb   :  { %p141_p3 = scmp.ne.s32.totalorder %s29_s13, %s140_s23  ;;  %p146_p5 = scmp.lt.s32.totalorder %s140_s23, %s140_s23 }
   0xd   :  { %p147_p6 = por %p146_p5, %p145_p4 }
   0xf   :  { %p148_p7 = pnand %p147_p6, %p141_p3 }
  0x11   :  { %151 = shalt.err (!%p148_p7)
}
  0x12   :  { %s226_s24 = smov 256   ;;  %s227_s25 = smov 16  }
  0x13   :  { %34 = dma.hbm_to_vmem [thread:$0]  %s315_s1, 512, %s29_s13, [#allocation6], %s226_s24, %s226_s24, %s227_s25  }
  0x14   :  { %s152_s30 = scalar_lea.hbm %s314_s0, 512 }
  0x15   :  { %p153_p8 = scmp.ne.s32.totalorder %s314_s0, %s152_s30  ;;  %p156_p9 = scmp.lt.u32.totalorder %s152_s30, %s314_s0 }
  0x17   :  { %p158_p10 = pnand %p156_p9, %p153_p8 }
  0x19   :  { %161 = shalt.err (!%p158_p10)
}
  0x1a   :  { %s162_s8 = scalar_lea.vmem %s250_s15, 512  ;;  %p167_p12 = scmp.lt.s32.totalorder %s250_s15, %s250_s15 }
  0x1b   :  { %p163_p11 = scmp.ne.s32.totalorder %s250_s15, %s162_s8  ;;  %p168_p13 = scmp.lt.s32.totalorder %s162_s8, %s162_s8 }
  0x1d   :  { %p169_p0 = por %p168_p13, %p167_p12 }
  0x1f   :  { %p170_p1 = pnand %p169_p0, %p163_p11 }
  0x21   :  { %173 = shalt.err (!%p170_p1)
}
  0x22   :  { %22 = dma.hbm_to_vmem [thread:$0]  %s314_s0, 512, %s250_s15, [#allocation3], %s226_s24, %s226_s24, %s227_s25  }
  0x23   :  { %s228_s10 = smov [#allocation7]   ;;  %s174_s14 = scalar_lea.hbm %s316_s2, 512 }
  0x24   :  { %s40_s11 = sshll.u32 %s228_s10, 4  ;;  %p175_p2 = scmp.ne.s32.totalorder %s316_s2, %s174_s14  ;;  %s41_s11 = int_to_ptr.vmem [resolvable:$true] %s40_s11 }
  0x25   :  { %p178_p3 = scmp.lt.u32.totalorder %s174_s14, %s316_s2 }
  0x27   :  { %p180_p4 = pnand %p178_p3, %p175_p2 }
  0x29   :  { %183 = shalt.err (!%p180_p4)
}
  0x2a   :  { %s184_s20 = scalar_lea.vmem %s41_s11, 512  ;;  %p189_p6 = scmp.lt.s32.totalorder %s41_s11, %s41_s11 }
  0x2b   :  { %p185_p5 = scmp.ne.s32.totalorder %s41_s11, %s184_s20  ;;  %p190_p7 = scmp.lt.s32.totalorder %s184_s20, %s184_s20 }
  0x2d   :  { %p191_p8 = por %p190_p7, %p189_p6 }
  0x2f   :  { %p192_p9 = pnand %p191_p8, %p185_p5 }
  0x31   :  { %195 = shalt.err (!%p192_p9)
}
  0x32   :  { %46 = dma.hbm_to_vmem [thread:$0]  %s316_s2, 512, %s41_s11, [#allocation6], %s226_s24, %s226_s24, %s227_s25  }
  0x33   :  { %218 = dma.done.wait [#allocation3], 512  }
  0x34   :  { %219 = vsyncadd [#allocation3], 4294966784 }
  0x35   :  { %220 = dma.done.wait [#allocation6], 1024  }
  0x36   :  { %221 = vsyncadd [#allocation6], 4294966272  ;;  %v56_v0 = vld [vmem:[#allocation2] sm:$0xff]  ;;  %v71_v6 = vld [vmem:[#allocation2 + $0x10] sm:$0xff]  ;;  %s229_s2 = smov [#allocation8]  }
  0x37   :  { %v58_v1 = vld [vmem:[#allocation5] sm:$0xff]  ;;  %v76_v7 = vld [vmem:[#allocation5 + $0x10] sm:$0xff]  ;;  %v73_v9 = vadd.f32 %v71_v6, %v56_v0  ;;  %v57_v13 = vld [vmem:[#allocation2 + $0x8] sm:$0xff]  ;;  %s114_s21 = sshll.u32 %s229_s2, 4  ;;  %s115_s21 = int_to_ptr.vmem [resolvable:$true] %s114_s21 }
  0x38   :  { %v60_v2 = vld [vmem:[#allocation7] sm:$0xff]  ;;  %v62_v3 = vmul.f32 %v58_v1, %v58_v1  ;;  %v79_v8 = vld [vmem:[#allocation7 + $0x10] sm:$0xff]  ;;  %v81_v10 = vmul.f32 %v76_v7, %v76_v7  ;;  %v59_v14 = vld [vmem:[#allocation5 + $0x8] sm:$0xff]  ;;  %s196_s22 = scalar_lea.vmem %s115_s21, 256  ;;  %p201_p11 = scmp.lt.s32.totalorder %s115_s21, %s115_s21 }
  0x39   :  { %v64_v4 = vmul.f32 %v60_v2, %v60_v2  ;;  %v68_v5 = vsub.f32 %v58_v1, %v60_v2  ;;  %v83_v11 = vmul.f32 %v79_v8, %v79_v8  ;;  %v89_v12 = vsub.f32 %v76_v7, %v79_v8  ;;  %v61_v15 = vld [vmem:[#allocation7 + $0x8] sm:$0xff]  ;;  %v72_v20 = vld [vmem:[#allocation2 + $0x18] sm:$0xff]  ;;  %p197_p10 = scmp.ne.s32.totalorder %s115_s21, %s196_s22  ;;  %p202_p12 = scmp.lt.s32.totalorder %s196_s22, %s196_s22 }
  0x3a   :  { %v63_v17 = vmul.f32 %v59_v14, %v59_v14  ;;  %v65_v18 = vmul.f32 %v61_v15, %v61_v15  ;;  %v69_v19 = vsub.f32 %v59_v14, %v61_v15  ;;  %v77_v21 = vld [vmem:[#allocation5 + $0x18] sm:$0xff]  ;;  %v95_v25 = vmul.f32 2.0, %v73_v9 }
  0x3b   :  { %v66_v16 = vsub.f32 %v62_v3, %v64_v4  ;;  %v80_v22 = vld [vmem:[#allocation7 + $0x18] sm:$0xff]  ;;  %v85_v23 = vsub.f32 %v81_v10, %v83_v11  ;;  %v91_v24 = vadd.f32 %v89_v12, %v68_v5  ;;  %v74_v26 = vadd.f32 %v72_v20, %v57_v13  ;;  %p203_p13 = por %p202_p12, %p201_p11 }
  0x3c   :  { %v67_v27 = vsub.f32 %v63_v17, %v65_v18  ;;  %v82_v28 = vmul.f32 %v77_v21, %v77_v21  ;;  %v84_v29 = vmul.f32 %v80_v22, %v80_v22  ;;  %v90_v30 = vsub.f32 %v77_v21, %v80_v22 }
  0x3d   :  { %v87_v31 = vadd.f32 %v85_v23, %v66_v16  ;;  %v97_v32 = vmul.f32 %v95_v25, %v91_v24  ;;  %v96_v33 = vmul.f32 2.0, %v74_v26  ;;  %p204_p0 = pnand %p203_p13, %p197_p10 }
  0x3e   :  { %v86_v34 = vsub.f32 %v82_v28, %v84_v29  ;;  %v92_v35 = vadd.f32 %v90_v30, %v69_v19 }
  0x3f   :  { %v93_v36 = vmul.f32 2.0, %v87_v31 }
  0x40   :  { %v88_v37 = vadd.f32 %v86_v34, %v67_v27  ;;  %v98_v38 = vmul.f32 %v96_v33, %v92_v35 }
  0x41   :  { %v99_v39 = vsub.f32 %v93_v36, %v97_v32 }
  0x42   :  { %v94_v40 = vmul.f32 2.0, %v88_v37 }
  0x43   :  { %v102_v41 = vmul.f32 0.5, %v99_v39 }
  0x44   :  { %v100_v42 = vsub.f32 %v94_v40, %v98_v38 }
  0x45   :  { %v104_v43 = vmul.f32 2.0, %v102_v41 }
  0x46   :  { %v103_v44 = vmul.f32 0.5, %v100_v42 }
  0x47   :  { %106 = vst [vmem:[#allocation8] sm:$0xff] %v104_v43 }
  0x48   :  { %v105_v45 = vmul.f32 2.0, %v103_v44 }
  0x4a   :  { %107 = vst [vmem:[#allocation8 + $0x8] sm:$0xff] %v105_v45 }
  0x4b   :  { %207 = shalt.err (!%p204_p0)
}
  0x4c   :  { %s208_s25 = scalar_lea.hbm %s317_s3, 256 }
  0x4d   :  { %p209_p1 = scmp.ne.s32.totalorder %s317_s3, %s208_s25  ;;  %p212_p2 = scmp.lt.u32.totalorder %s208_s25, %s317_s3 }
  0x4f   :  { %p214_p3 = pnand %p212_p2, %p209_p1 }
  0x51   :  { %217 = shalt.err (!%p214_p3)
}
  0x52   :  { %117 = dma.vmem_to_hbm [thread:$0]  %s115_s21, 256, %s317_s3, [#allocation4]  }
  0x53   :  { %222 = dma.done.wait [#allocation4], 256  }
  0x54   :  { %223 = vsyncadd [#allocation4], 4294967040 }
  0x55   :  { %121 = vsyncpa [#allocation3], 1 }
  0x56   :  { %122 = vsyncpa [#allocation6], 1 }
  0x57   :  { %123 = vsyncpa [#allocation4], 1 }

</bundles_post_ra>
